<compile_context>
chip_gen: v7x
topology: tpu7x:2x2x1
jax: 0.10.0
libtpu: 0.0.40
codegen_flags: <defaults>
</compile_context>

<pallas_src>
import functools

import jax
import jax.numpy as jnp
from jax import lax
from jax.experimental import pallas as pl
from jax.experimental.pallas import tpu as pltpu


def _poisson_prior_kernel(zt_ref, at_ref, z0t_ref, out_ref, carry_ref):
    """One lane-tile of the forward pass.

    zt_ref:    (K, TM) block of z.T (T on lanes)
    at_ref:    (K, K)  A.T  (at[:, j] == A[j, :]), resident
    z0t_ref:   (K, 1)  z0.T, resident
    out_ref:   (K, TM) block of out.T
    carry_ref: (K, 1)  VMEM scratch: prod column carried into the next tile
    """
    K, TM = zt_ref.shape
    i = pl.program_id(0)

    # First tile: the carry (global output column 0) is z0.
    @pl.when(i == 0)
    def _():
        carry_ref[...] = z0t_ref[...]

    z = zt_ref[...]                                      # (K, TM) f32

    # argmax over the K sublane rows, first occurrence on ties, via K-1
    # unrolled pairwise compare/selects on the VPU.
    # NOTE: NaN rows keep the running best (NaN never selected unless at
    # index 0), which differs from torch/jnp argmax on NaN input; inputs are
    # assumed NaN-free.
    best_val = z[0:1, :]                                 # (1, TM)
    best_idx = jnp.zeros((1, TM), dtype=jnp.int32)
    for k in range(1, K):
        v = z[k:k + 1, :]
        gt = v > best_val
        best_val = jnp.where(gt, v, best_val)
        best_idx = jnp.where(gt, k, best_idx)

    # prod[:, t] = A[best_idx[t], :]   (== (one_hot @ A).T column t)
    # K-deep select tree against the resident columns of A.T — no MXU.
    at = at_ref[...]                                     # (K, K)
    prod = jnp.zeros((K, TM), dtype=jnp.float32)
    for j in range(K):
        a_row_j = at[:, j:j + 1]                         # (K, 1) == A[j, :].T
        prod = prod + jnp.where(best_idx == j, a_row_j, 0.0)

    # Shift by one along T and store the whole tile in one aligned vst:
    #   out[:, 0] = carry (z0 or last prod column of the previous tile)
    #   out[:, t] = prod[:, t-1]  for t >= 1
    shifted = pltpu.roll(prod, shift=1, axis=1)          # XLU lane rotate
    lane = lax.broadcasted_iota(jnp.int32, (K, TM), 1)
    out_ref[...] = jnp.where(lane == 0, carry_ref[...], shifted)

    # Carry the last prod column into the next tile.
    carry_ref[...] = prod[:, TM - 1:TM]


@functools.partial(jax.jit, static_argnames=("tile_t",))
def poisson_prior_forward(z, A, z0, *, tile_t=32768):
    """z: (T, K) f32, A: (K, K) f32, z0: (1, K) f32 -> (T, K) f32."""
    T, K = z.shape

    # Lane-dense layout: put T on the lane axis.
    zt = z.T.astype(jnp.float32)             # (K, T)
    at = A.T.astype(jnp.float32)             # (K, K); at[:, j] == A[j, :]
    z0t = z0.T.astype(jnp.float32)           # (K, 1)

    # Lane-tile size: a multiple of 128 for large T (pipelined, amortizes the
    # ~0.35 us per-grid-step overhead); a single full-extent block otherwise.
    tm = tile_t if T > tile_t else T
    grid = (pl.cdiv(T, tm),)

    out_t = pl.pallas_call(
        _poisson_prior_kernel,
        out_shape=jax.ShapeDtypeStruct((K, T), jnp.float32),
        grid_spec=pltpu.PrefetchScalarGridSpec(
            num_scalar_prefetch=0,
            grid=grid,
            in_specs=[
                pl.BlockSpec((K, tm), lambda i: (0, i)),   # z.T, streamed
                pl.BlockSpec((K, K), lambda i: (0, 0)),    # A.T, resident
                pl.BlockSpec((K, 1), lambda i: (0, 0)),    # z0.T, resident
            ],
            out_specs=pl.BlockSpec((K, tm), lambda i: (0, i)),
            scratch_shapes=[pltpu.VMEM((K, 1), jnp.float32)],  # cross-tile carry
        ),
        # Sequential T axis: the one-column carry crosses tile boundaries.
        compiler_params=pltpu.CompilerParams(
            dimension_semantics=("arbitrary",)),
    )(zt, at, z0t)

    return out_t.T                            # back to the module's (T, K) layout


def make_params(K, p):
    # Deterministic construction, mirroring the module's __init__.
    z0 = jnp.full((1, K), 1.0 / K, dtype=jnp.float32)
    off = (1.0 - p) / (K - 1)
    A = jnp.full((K, K), off, dtype=jnp.float32)
    A = A.at[jnp.arange(K), jnp.arange(K)].set(p)
    return z0, A


def reference_forward(z, A, z0):
    sel = jnp.argmax(z, axis=-1)
    one_hot = jnp.eye(z.shape[-1], dtype=jnp.float32)[sel]
    target = one_hot @ A
    return jnp.concatenate([z0, target[:-1, :]], axis=0)


if __name__ == "__main__":
    K = 4
    p = 0.8

    z0, A = make_params(K, p)
    key = jax.random.PRNGKey(0)

    # Small shape consistent with the module usage: z is (T, K).
    T = 8
    z = jax.random.normal(key, (T, K), dtype=jnp.float32)
    out = jax.block_until_ready(poisson_prior_forward(z, A, z0))
    ref = jax.block_until_ready(reference_forward(z, A, z0))
    assert out.shape == (T, K)
    assert jnp.allclose(out, ref, atol=1e-6), "mismatch vs reference (T=8)"

    # Exercise the tiled path: multiple lane tiles, cross-tile carry, and a
    # partial last block (300 = 2*128 + 44).
    T2 = 300
    z2 = jax.random.normal(jax.random.PRNGKey(1), (T2, K), dtype=jnp.float32)
    out2 = jax.block_until_ready(poisson_prior_forward(z2, A, z0, tile_t=128))
    ref2 = jax.block_until_ready(reference_forward(z2, A, z0))
    assert out2.shape == (T2, K)
    assert jnp.allclose(out2, ref2, atol=1e-6), "mismatch vs reference (T=300)"

    print("KERNEL_OK")
</pallas_src>

<mosaic_0001>
module attributes {stable_mosaic.version = 11 : i64} {
  func.func @_poisson_prior_kernel(%arg0: i32, %arg1: memref<4x8xf32, #tpu.memory_space<vmem>>, %arg2: memref<4x4xf32, #tpu.memory_space<vmem>>, %arg3: memref<4x1xf32, #tpu.memory_space<vmem>>, %arg4: memref<4x8xf32, #tpu.memory_space<vmem>>, %arg5: memref<4x1xf32, #tpu.memory_space<vmem>>) attributes {dimension_semantics = [#tpu.dimension_semantics<arbitrary>], iteration_bounds = array<i64: 1>, scalar_prefetch = 0 : i64, scratch_operands = 1 : i64, tpu.core_type = #tpu.core_type<tc>, window_params = [{transform_indices = @transform_0, window_bounds = array<i64: 4, 8>}, {pipeline_mode = #tpu.pipeline_mode<synchronous>, transform_indices = @transform_1, window_bounds = array<i64: 4, 4>}, {pipeline_mode = #tpu.pipeline_mode<synchronous>, transform_indices = @transform_2, window_bounds = array<i64: 4, 1>}, {transform_indices = @transform_3, window_bounds = array<i64: 4, 8>}]} {
    %c0_i32 = arith.constant 0 : i32
    %0 = arith.cmpi eq, %arg0, %c0_i32 : i32
    %1 = arith.extui %0 : i1 to i32
    %c0_i32_0 = arith.constant 0 : i32
    %2 = arith.cmpi ne, %1, %c0_i32_0 : i32
    scf.if %2 {
      %c0_21 = arith.constant 0 : index
      %c0_22 = arith.constant 0 : index
      %73 = vector.load %arg3[%c0_21, %c0_22] : memref<4x1xf32, #tpu.memory_space<vmem>>, vector<4x1xf32>
      %c0_23 = arith.constant 0 : index
      %c0_24 = arith.constant 0 : index
      %74 = vector.load %arg5[%c0_23, %c0_24] : memref<4x1xf32, #tpu.memory_space<vmem>>, vector<4x1xf32>
      tpu.vector_store %arg5[%c0_23, %c0_24], %73 {strides = array<i32>} : memref<4x1xf32, #tpu.memory_space<vmem>>, vector<4x1xf32>,
    } else {
    }
    %c0 = arith.constant 0 : index
    %c0_1 = arith.constant 0 : index
    %3 = vector.load %arg1[%c0, %c0_1] : memref<4x8xf32, #tpu.memory_space<vmem>>, vector<4x8xf32>
    %4 = vector.extract_strided_slice %3 {offsets = [0, 0], sizes = [1, 8], strides = [1, 1]} : vector<4x8xf32> to vector<1x8xf32>
    %c0_i32_2 = arith.constant 0 : i32
    %5 = vector.broadcast %c0_i32_2 : i32 to vector<1x8xi32>
    %6 = vector.extract_strided_slice %3 {offsets = [1, 0], sizes = [1, 8], strides = [1, 1]} : vector<4x8xf32> to vector<1x8xf32>
    %7 = arith.cmpf ogt, %6, %4 : vector<1x8xf32>
    %8 = arith.select %7, %6, %4 : vector<1x8xi1>, vector<1x8xf32>
    %c1_i32 = arith.constant 1 : i32
    %9 = vector.broadcast %c1_i32 : i32 to vector<1x8xi32>
    %10 = arith.select %7, %9, %5 : vector<1x8xi1>, vector<1x8xi32>
    %11 = vector.extract_strided_slice %3 {offsets = [2, 0], sizes = [1, 8], strides = [1, 1]} : vector<4x8xf32> to vector<1x8xf32>
    %12 = arith.cmpf ogt, %11, %8 : vector<1x8xf32>
    %13 = arith.select %12, %11, %8 : vector<1x8xi1>, vector<1x8xf32>
    %c2_i32 = arith.constant 2 : i32
    %14 = vector.broadcast %c2_i32 : i32 to vector<1x8xi32>
    %15 = arith.select %12, %14, %10 : vector<1x8xi1>, vector<1x8xi32>
    %16 = vector.extract_strided_slice %3 {offsets = [3, 0], sizes = [1, 8], strides = [1, 1]} : vector<4x8xf32> to vector<1x8xf32>
    %17 = arith.cmpf ogt, %16, %13 : vector<1x8xf32>
    %c3_i32 = arith.constant 3 : i32
    %18 = vector.broadcast %c3_i32 : i32 to vector<1x8xi32>
    %19 = arith.select %17, %18, %15 : vector<1x8xi1>, vector<1x8xi32>
    %c0_3 = arith.constant 0 : index
    %c0_4 = arith.constant 0 : index
    %20 = vector.load %arg2[%c0_3, %c0_4] : memref<4x4xf32, #tpu.memory_space<vmem>>, vector<4x4xf32>
    %cst = arith.constant 0.000000e+00 : f32
    %21 = vector.broadcast %cst : f32 to vector<4x8xf32>
    %22 = vector.extract_strided_slice %20 {offsets = [0, 0], sizes = [4, 1], strides = [1, 1]} : vector<4x4xf32> to vector<4x1xf32>
    %c0_i32_5 = arith.constant 0 : i32
    %23 = vector.broadcast %c0_i32_5 : i32 to vector<1x8xi32>
    %24 = arith.cmpi eq, %19, %23 : vector<1x8xi32>
    %cst_6 = arith.constant 0.000000e+00 : f32
    %25 = vector.shape_cast %24 : vector<1x8xi1> to vector<1x8xi1>
    %26 = vector.broadcast %25 : vector<1x8xi1> to vector<4x8xi1>
    %27 = vector.shape_cast %22 : vector<4x1xf32> to vector<4x1xf32>
    %28 = vector.broadcast %27 : vector<4x1xf32> to vector<4x8xf32>
    %29 = vector.broadcast %cst_6 : f32 to vector<4x8xf32>
    %30 = arith.select %26, %28, %29 : vector<4x8xi1>, vector<4x8xf32>
    %31 = arith.addf %21, %30 : vector<4x8xf32>
    %32 = vector.extract_strided_slice %20 {offsets = [0, 1], sizes = [4, 1], strides = [1, 1]} : vector<4x4xf32> to vector<4x1xf32>
    %c1_i32_7 = arith.constant 1 : i32
    %33 = vector.broadcast %c1_i32_7 : i32 to vector<1x8xi32>
    %34 = arith.cmpi eq, %19, %33 : vector<1x8xi32>
    %cst_8 = arith.constant 0.000000e+00 : f32
    %35 = vector.shape_cast %34 : vector<1x8xi1> to vector<1x8xi1>
    %36 = vector.broadcast %35 : vector<1x8xi1> to vector<4x8xi1>
    %37 = vector.shape_cast %32 : vector<4x1xf32> to vector<4x1xf32>
    %38 = vector.broadcast %37 : vector<4x1xf32> to vector<4x8xf32>
    %39 = vector.broadcast %cst_8 : f32 to vector<4x8xf32>
    %40 = arith.select %36, %38, %39 : vector<4x8xi1>, vector<4x8xf32>
    %41 = arith.addf %31, %40 : vector<4x8xf32>
    %42 = vector.extract_strided_slice %20 {offsets = [0, 2], sizes = [4, 1], strides = [1, 1]} : vector<4x4xf32> to vector<4x1xf32>
    %c2_i32_9 = arith.constant 2 : i32
    %43 = vector.broadcast %c2_i32_9 : i32 to vector<1x8xi32>
    %44 = arith.cmpi eq, %19, %43 : vector<1x8xi32>
    %cst_10 = arith.constant 0.000000e+00 : f32
    %45 = vector.shape_cast %44 : vector<1x8xi1> to vector<1x8xi1>
    %46 = vector.broadcast %45 : vector<1x8xi1> to vector<4x8xi1>
    %47 = vector.shape_cast %42 : vector<4x1xf32> to vector<4x1xf32>
    %48 = vector.broadcast %47 : vector<4x1xf32> to vector<4x8xf32>
    %49 = vector.broadcast %cst_10 : f32 to vector<4x8xf32>
    %50 = arith.select %46, %48, %49 : vector<4x8xi1>, vector<4x8xf32>
    %51 = arith.addf %41, %50 : vector<4x8xf32>
    %52 = vector.extract_strided_slice %20 {offsets = [0, 3], sizes = [4, 1], strides = [1, 1]} : vector<4x4xf32> to vector<4x1xf32>
    %c3_i32_11 = arith.constant 3 : i32
    %53 = vector.broadcast %c3_i32_11 : i32 to vector<1x8xi32>
    %54 = arith.cmpi eq, %19, %53 : vector<1x8xi32>
    %cst_12 = arith.constant 0.000000e+00 : f32
    %55 = vector.shape_cast %54 : vector<1x8xi1> to vector<1x8xi1>
    %56 = vector.broadcast %55 : vector<1x8xi1> to vector<4x8xi1>
    %57 = vector.shape_cast %52 : vector<4x1xf32> to vector<4x1xf32>
    %58 = vector.broadcast %57 : vector<4x1xf32> to vector<4x8xf32>
    %59 = vector.broadcast %cst_12 : f32 to vector<4x8xf32>
    %60 = arith.select %56, %58, %59 : vector<4x8xi1>, vector<4x8xf32>
    %61 = arith.addf %51, %60 : vector<4x8xf32>
    %c1_i32_13 = arith.constant 1 : i32
    %62 = tpu.dynamic_rotate %61 by %c1_i32_13 dim 1 : vector<4x8xf32>, i32 -> vector<4x8xf32>
    %63 = tpu.iota {dimensions = array<i32: 1>} : vector<4x8xi32>
    %c0_i32_14 = arith.constant 0 : i32
    %64 = vector.broadcast %c0_i32_14 : i32 to vector<4x8xi32>
    %65 = arith.cmpi eq, %63, %64 : vector<4x8xi32>
    %c0_15 = arith.constant 0 : index
    %c0_16 = arith.constant 0 : index
    %66 = vector.load %arg5[%c0_15, %c0_16] : memref<4x1xf32, #tpu.memory_space<vmem>>, vector<4x1xf32>
    %67 = vector.shape_cast %66 : vector<4x1xf32> to vector<4x1xf32>
    %68 = vector.broadcast %67 : vector<4x1xf32> to vector<4x8xf32>
    %69 = arith.select %65, %68, %62 : vector<4x8xi1>, vector<4x8xf32>
    %c0_17 = arith.constant 0 : index
    %c0_18 = arith.constant 0 : index
    %70 = vector.load %arg4[%c0_17, %c0_18] : memref<4x8xf32, #tpu.memory_space<vmem>>, vector<4x8xf32>
    tpu.vector_store %arg4[%c0_17, %c0_18], %69 {strides = array<i32>} : memref<4x8xf32, #tpu.memory_space<vmem>>, vector<4x8xf32>,
    %71 = vector.extract_strided_slice %61 {offsets = [0, 7], sizes = [4, 1], strides = [1, 1]} : vector<4x8xf32> to vector<4x1xf32>
    %c0_19 = arith.constant 0 : index
    %c0_20 = arith.constant 0 : index
    %72 = vector.load %arg5[%c0_19, %c0_20] : memref<4x1xf32, #tpu.memory_space<vmem>>, vector<4x1xf32>
    tpu.vector_store %arg5[%c0_19, %c0_20], %71 {strides = array<i32>} : memref<4x1xf32, #tpu.memory_space<vmem>>, vector<4x1xf32>,
    return
  }
  func.func @transform_0(%arg0: i32) -> (i32, i32) {
    %c0_i32 = arith.constant 0 : i32
    %c0_i32_0 = arith.constant 0 : i32
    return %c0_i32, %arg0 : i32, i32
  }
  func.func @transform_1(%arg0: i32) -> (i32, i32) {
    %c0_i32 = arith.constant 0 : i32
    %c0_i32_0 = arith.constant 0 : i32
    %c0_i32_1 = arith.constant 0 : i32
    return %c0_i32, %c0_i32_0 : i32, i32
  }
  func.func @transform_2(%arg0: i32) -> (i32, i32) {
    %c0_i32 = arith.constant 0 : i32
    %c0_i32_0 = arith.constant 0 : i32
    %c0_i32_1 = arith.constant 0 : i32
    return %c0_i32, %c0_i32_0 : i32, i32
  }
  func.func @transform_3(%arg0: i32) -> (i32, i32) {
    %c0_i32 = arith.constant 0 : i32
    %c0_i32_0 = arith.constant 0 : i32
    return %c0_i32, %arg0 : i32, i32
  }
}

</mosaic_0001>

<bundles_post_ra>
// kernel: poisson_prior_forward.1
= control target key start
LH: loop header
LB: loop body
LE: loop exit
PB: predicated region body
PF: predicated region fallthrough
CT: control target
= control target key end

     0   :  { %v176_v1 = vmov 0   ;;  %v177_v2 = vmov 2   ;;  %s226_s0 = inlined_call_operand.vmem [shape: f32[4,8], index: 0, kind: input, shape index: {}]   ;;  %s227_s1 = inlined_call_operand.vmem [shape: f32[4,4], index: 1, kind: input, shape index: {}]   ;;  %s228_s2 = inlined_call_operand.vmem [shape: f32[4,1], index: 2, kind: input, shape index: {}]   ;;  %s229_s3 = inlined_call_operand.hbm [shape: f32[4,8], index: 3, kind: output, shape index: {}]  }
   0x1   :  { %v42_v0 = vld [vmem:[%s227_s1] sm:$0xf]  ;;  %146 = vset.pattern.permute.xlu0 %v176_v1  ;;  %148 = vset.pattern.permute.xlu1 %v177_v2 }
   0x2   :  { %8 = vsyncpa [#allocation4], 0  ;;  %52 = vperm.xlu0 %146, %v42_v0   ;;  %78 = vperm.xlu1 %148, %v42_v0   ;;  %v178_v3 = vmov 1   ;;  %v179_v4 = vmov 3   ;;  %v19_v5 = vld [vmem:[%s228_s2] sm:$0xf]  ;;  %v45_v16 = vlaneseq }
   0x3   :  { %vm20_vm0 = vcmask 3072   ;;  %v22_v6 = vld [vmem:[%s226_s0] sm:$0xf]  ;;  %s180_s0 = smov 8   ;;  %s181_s2 = smov 121   ;;  %vm96_vm12 = vcmask 1047616  }
   0x4   :  { %21 = vst.msk [vmem:[#allocation2] sm:$0xf] %vm20_vm0, %v19_v5  ;;  %v24_v7 = vrot.slane %v22_v6, 7  ;;  %v46_v18 = vshrl.u32 %v45_v16, 7  ;;  %v104_v46 = vand.u32 127, %v45_v16  ;;  %s182_s17 = smov [#allocation3]  }
   0x5   :  { %s131_s18 = sshll.u32 %s182_s17, 4  ;;  %vm117_vm14 = vcmask 60416   ;;  %s132_s18 = int_to_ptr.vmem [resolvable:$true] %s131_s18 }
   0x6   :  { %147 = vset.pattern.permute.xlu0 %v178_v3  ;;  %149 = vset.pattern.permute.xlu1 %v179_v4  ;;  %vm26_vm1 = vcmp.gt.f32.partialorder %v22_v6, %v24_v7  ;;  %v47_v19 = vsub.s32 3, %v46_v18  ;;  %vm105_vm13 = vcmp.eq.s32.totalorder %v104_v46, 0  ;;  %s152_s19 = scalar_lea.vmem %s132_s18, 64  ;;  %p157_p1 = scmp.lt.s32.totalorder %s132_s18, %s132_s18 }
   0x7   :  { %65 = vperm.xlu0 %147, %v42_v0   ;;  %91 = vperm.xlu1 %149, %v42_v0   ;;  %v27_v8 = vsel %vm26_vm1, %v22_v6, %v24_v7  ;;  %v28_v10 = vsel %vm26_vm1, 1, %v176_v1  ;;  %p153_p0 = scmp.ne.s32.totalorder %s132_s18, %s152_s19  ;;  %p158_p2 = scmp.lt.s32.totalorder %s152_s19, %s152_s19 }
   0x8   :  { %v30_v9 = vrot.slane %v27_v8, 7  ;;  %v34_v11 = vrot.slane %v28_v10, 7 }
   0x9   :  { %p159_p3 = por %p158_p2, %p157_p1 }
   0xa   :  { %vm32_vm2 = vcmp.gt.f32.partialorder %v22_v6, %v30_v9 }
   0xb   :  { %150 = vset.pattern.permute.xlu1 %v176_v1  ;;  %151 = vset.pattern.permute.xlu0 %v176_v1  ;;  %v33_v12 = vsel %vm32_vm2, %v22_v6, %v30_v9  ;;  %v35_v13 = vsel %vm32_vm2, 2, %v34_v11  ;;  %v106_v39 = vld [vmem:[#allocation2] sm:$0xf]  ;;  %p160_p4 = pnand %p159_p3, %p153_p0 }
   0xc   :  { %v37_v14 = vrot.slane %v33_v12, 7  ;;  %v40_v15 = vrot.slane %v35_v13, 7 }
   0xe   :  { %vm39_vm3 = vcmp.gt.f32.partialorder %v22_v6, %v37_v14 }
   0xf   :  { %v41_v17 = vsel %vm39_vm3, 3, %v40_v15 }
  0x10   :  { %vm43_vm4 = vcmp.eq.s32.totalorder %v41_v17, 0  ;;  %vm57_vm5 = vcmp.eq.s32.totalorder %v41_v17, 1  ;;  %vm70_vm6 = vcmp.eq.s32.totalorder %v41_v17, 2  ;;  %vm83_vm7 = vcmp.eq.s32.totalorder %v41_v17, 3 }
  0x11   :  { %v44_v20 = vsel %vm43_vm4, 1, %v176_v1  ;;  %v58_v21 = vsel %vm57_vm5, 1, %v176_v1  ;;  %v71_v22 = vsel %vm70_vm6, 1, %v176_v1  ;;  %v84_v23 = vsel %vm83_vm7, 1, %v176_v1 }
  0x12   :  { %v48_v24 = vrot.slane %v44_v20, %v47_v19  ;;  %v62_v25 = vrot.slane %v58_v21, %v47_v19  ;;  %v75_v28 = vrot.slane %v71_v22, %v47_v19  ;;  %v88_v29 = vrot.slane %v84_v23, %v47_v19 }
  0x14   :  { %vm49_vm8 = vcmp.eq.s32.totalorder %v48_v24, 1  ;;  %vm63_vm9 = vcmp.eq.s32.totalorder %v62_v25, 1  ;;  %vm76_vm10 = vcmp.eq.s32.totalorder %v75_v28, 1  ;;  %vm89_vm11 = vcmp.eq.s32.totalorder %v88_v29, 1 }
  0x81   :  { %v53_v26 = vpop.permute.xlu0 %52  ;;  %v79_v27 = vpop.permute.xlu1 %78 }
  0x82   :  { %v55_v32 = vsel %vm49_vm8, %v53_v26, 0.0  ;;  %v81_v35 = vsel %vm76_vm10, %v79_v27, 0.0 }
  0x86   :  { %v66_v30 = vpop.permute.xlu0 %65  ;;  %v92_v31 = vpop.permute.xlu1 %91 }
  0x87   :  { %v68_v33 = vsel %vm63_vm9, %v66_v30, 0.0  ;;  %v94_v36 = vsel %vm89_vm11, %v92_v31, 0.0 }
  0x88   :  { %v69_v34 = vadd.f32 %v68_v33, %v55_v32 }
  0x8a   :  { %v82_v37 = vadd.f32 %v81_v35, %v69_v34 }
  0x8c   :  { %v95_v38 = vadd.f32 %v94_v36, %v82_v37 }
  0x8e   :  { %97 = vrot.lane.b32.xlu1 %v95_v38, %s180_s0 }
  0x92   :  { %109 = vperm.xlu1 %150, %v106_v39  }
  0x96   :  { %120 = vrot.lane.b32.xlu1 %v95_v38, %s181_s2 }
 0x100   :  { %v98_v40 = vpop.permute.xlu1 %97 }
 0x101   :  { %v99_v41 = vsel %vm96_vm12, %v98_v40, %v95_v38 }
 0x102   :  { %100 = vrot.lane.b32.xlu0 %v99_v41, %s180_s0 }
 0x111   :  { %v110_v42 = vpop.permute.xlu1 %109 }
 0x115   :  { %v121_v43 = vpop.permute.xlu1 %120 }
 0x116   :  { %124 = vst.msk [vmem:[#allocation2] sm:$0xf] %vm20_vm0, %v121_v43 }
 0x174   :  { %v101_v44 = vpop.permute.xlu0 %100 }
 0x175   :  { %v102_v45 = vsel %vm96_vm12, %v101_v44, %v95_v38 }
 0x176   :  { %113 = vrot.lane.b32.xlu0 %v102_v45, %s181_s2 }
 0x1e8   :  { %v114_v47 = vpop.permute.xlu0 %113 }
 0x1e9   :  { %v116_v48 = vsel %vm105_vm13, %v110_v42, %v114_v47 }
 0x1ea   :  { %118 = vst.msk [vmem:[#allocation3] sm:$0xf] %vm117_vm14, %v116_v48 }
 0x1eb   :  { %163 = shalt.err (!%p160_p4)
}
 0x1ec   :  { %s164_s22 = scalar_lea.hbm %s229_s3, 64 }
 0x1ed   :  { %p165_p5 = scmp.ne.s32.totalorder %s229_s3, %s164_s22  ;;  %p168_p6 = scmp.lt.u32.totalorder %s164_s22, %s229_s3 }
 0x1ef   :  { %p170_p7 = pnand %p168_p6, %p165_p5 }
 0x1f1   :  { %173 = shalt.err (!%p170_p7)
}
 0x1f2   :  { %134 = dma.vmem_to_hbm [thread:$0]  %s132_s18, 64, %s229_s3, [#allocation4]  }
 0x1f3   :  { %174 = dma.done.wait [#allocation4], 64  }
 0x1f4   :  { %175 = vsyncadd [#allocation4], 4294967232 }
 0x1f5   :  { %138 = vsyncpa [#allocation4], 1 }

</bundles_post_ra>
